<compile_context>
chip_gen: v5e
topology: v5e:2x2
jax: 0.10.0
libtpu: 0.0.40
codegen_flags: <defaults>
</compile_context>

<pallas_src>
import jax
import jax.numpy as jnp
from jax.experimental import pallas as pl
from jax.experimental.pallas import tpu as pltpu


def _round_up(a: int, b: int) -> int:
    return (a + b - 1) // b * b


_VMEM_BUDGET = 40 * 1024 * 1024   # conservative: fits v7x's 64 MiB physical VMEM
_VMEM_CAP = 56 * 1024 * 1024      # never ask for more than this


# ---- exact GELU (erf form, like torch.nn.functional.gelu default) -----------
_ERF_P = 0.3275911
_ERF_A1 = 0.254829592
_ERF_A2 = -0.284496736
_ERF_A3 = 1.421413741
_ERF_A4 = -1.453152027
_ERF_A5 = 1.061405429


def _erf(x):
    # Abramowitz & Stegun 7.1.26, |err| <= 1.5e-7.  mul/add -> VPU,
    # reciprocal + exp -> EUP (separate issue slot, effectively free).
    a = jnp.abs(x)
    t = pl.reciprocal(1.0 + _ERF_P * a, approx=True)
    poly = t * (_ERF_A1 + t * (_ERF_A2 + t * (_ERF_A3 + t * (_ERF_A4 + t * _ERF_A5))))
    y = 1.0 - poly * jnp.exp(-a * a)
    return jnp.where(x < 0.0, -y, y)


def _gelu_exact(x):
    return 0.5 * x * (1.0 + _erf(x * 0.7071067811865476))


# ---- kernel ------------------------------------------------------------------
def ffn_kernel(x_ref, w1_ref, b1_ref, w2_ref, b2_ref, o_ref):
    """One (row-tile i, inner-tile j) grid step.

    x_ref:  (tm, Dp)  bf16 input rows
    w1_ref: (Dp, ti)  bf16 lin1 weight column tile (pre-transposed: in x out)
    b1_ref: (1,  ti)  f32  lin1 bias tile
    w2_ref: (ti, Dp)  bf16 lin2 weight row tile (pre-transposed)
    b2_ref: (1,  Dp)  f32  lin2 bias
    o_ref:  (tm, Dp)  f32  output rows; resident across j -> used as accumulator
    """
    j = pl.program_id(1)

    @pl.when(j == 0)
    def _init():
        o_ref[...] = jnp.zeros_like(o_ref)

    # lin1 for this d_inner column tile: bf16 MXU, f32 accumulate.
    h = jnp.dot(x_ref[...], w1_ref[...], preferred_element_type=jnp.float32)
    h = _gelu_exact(h + b1_ref[...])
    # Partial lin2 contribution of this d_inner tile, accumulated into the
    # resident f32 output block.
    o_ref[...] += jnp.dot(h.astype(w2_ref.dtype), w2_ref[...],
                          preferred_element_type=jnp.float32)

    @pl.when(j == pl.num_programs(1) - 1)
    def _finalize():
        o_ref[...] = o_ref[...] + b2_ref[...]


# ---- tiling ------------------------------------------------------------------
def _choose_tiles(M, Dp, Ip, budget=_VMEM_BUDGET):
    # Row tile: multiple of 16 (bf16 sublane packing), large enough to raise
    # arithmetic intensity on the weight stream, capped at 512.
    tm = min(512, _round_up(M, 16))
    # v7x has 2 TensorCores: keep >= 2 blocks on the "parallel" row axis when
    # M is big enough to split into decent tiles.
    if M >= 256:
        while tm >= 32 and -(-M // tm) < 2:
            tm //= 2
        tm = max(16, (tm // 16) * 16)

    # Per-step activation footprint: bf16 x (double-buffered) + f32 out
    # (double-buffered) + biases.
    act_bytes = 2 * tm * Dp * 2 + 2 * tm * Dp * 4 + 4 * (Ip + Dp)
    remaining = budget - act_bytes

    def w_bytes(t):  # both weight tiles, bf16, double-buffered
        return 2 * (Dp * t + t * Dp) * 2

    if w_bytes(Ip) <= remaining:
        ti = Ip                      # fully resident weights: DMA'd once, period
    else:
        ti = 128
        for cand in (2048, 1024, 512, 256, 128):
            if Ip % cand == 0 and w_bytes(cand) <= remaining:
                ti = cand
                break
    return tm, ti


# ---- parameter preprocessing (hoisted out of the hot path) --------------------
def prepare_ffn_params(w1, b1, w2, b2):
    """Transpose + zero-pad + cast the PyTorch nn.Linear params ONCE.
       w1: (d_inner, d_model), b1: (d_inner,), w2: (d_model, d_inner), b2: (d_model,)."""
    I, D = w1.shape
    Dp = _round_up(D, 128)
    Ip = _round_up(I, 128)
    bf16, f32 = jnp.bfloat16, jnp.float32
    w1t = jnp.zeros((Dp, Ip), bf16).at[:D, :I].set(w1.T.astype(bf16))  # (in, out)
    w2t = jnp.zeros((Ip, Dp), bf16).at[:I, :D].set(w2.T.astype(bf16))  # (in, out)
    b1p = jnp.zeros((1, Ip), f32).at[0, :I].set(b1.astype(f32))
    b2p = jnp.zeros((1, Dp), f32).at[0, :D].set(b2.astype(f32))
    return {"w1t": w1t, "b1p": b1p, "w2t": w2t, "b2p": b2p}


# ---- wrapper -----------------------------------------------------------------
def feed_forward(x, params):
    """x: (B, S, d_model) float; params from prepare_ffn_params."""
    B, S, D = x.shape
    w1t, b1p, w2t, b2p = params["w1t"], params["b1p"], params["w2t"], params["b2p"]
    Dp, Ip = w1t.shape
    M = B * S

    tm, ti = _choose_tiles(M, Dp, Ip)
    Mp = _round_up(M, tm)

    x2 = x.reshape(M, D).astype(jnp.bfloat16)
    if (Mp, Dp) != (M, D):       # skip the pad entirely when already aligned
        x2 = jnp.zeros((Mp, Dp), jnp.bfloat16).at[:M, :D].set(x2)

    grid = (Mp // tm, Ip // ti)

    # Weights are fetched once total if resident (ti == Ip), else once per row tile.
    w_passes = 1 if ti == Ip else grid[0]
    cost = pl.CostEstimate(
        flops=4 * Mp * Dp * Ip,                       # two matmuls
        transcendentals=2 * Mp * Ip,                  # exp + reciprocal in GELU
        bytes_accessed=(2 * Mp * Dp                   # bf16 x read
                        + 4 * Mp * Dp                 # f32 out write
                        + w_passes * 2 * Dp * Ip * 2  # bf16 weight stream
                        + 4 * (Ip + Dp)),             # biases
    )

    vmem_need = (2 * tm * Dp * 2 + 2 * tm * Dp * 4          # x + out (double-buffered)
                 + 2 * (Dp * ti + ti * Dp) * 2               # weight tiles
                 + 2 * 4 * (Ip + Dp) + (1 << 20))            # biases + headroom
    vmem_limit = int(min(max(vmem_need, 16 << 20), _VMEM_CAP))

    out = pl.pallas_call(
        ffn_kernel,
        out_shape=jax.ShapeDtypeStruct((Mp, Dp), jnp.float32),
        grid_spec=pltpu.PrefetchScalarGridSpec(
            num_scalar_prefetch=0,
            grid=grid,
            in_specs=[
                pl.BlockSpec((tm, Dp), lambda i, j: (i, 0)),   # x row tile
                pl.BlockSpec((Dp, ti), lambda i, j: (0, j)),   # W1^T col tile
                pl.BlockSpec((1, ti), lambda i, j: (0, j)),    # b1 tile
                pl.BlockSpec((ti, Dp), lambda i, j: (j, 0)),   # W2^T row tile
                pl.BlockSpec((1, Dp), lambda i, j: (0, 0)),    # b2 (resident)
            ],
            out_specs=pl.BlockSpec((tm, Dp), lambda i, j: (i, 0)),
        ),
        compiler_params=pltpu.CompilerParams(
            dimension_semantics=("parallel", "arbitrary"),
            vmem_limit_bytes=vmem_limit),
        cost_estimate=cost,
    )(x2, w1t, b1p, w2t, b2p)

    return out[:M, :D].reshape(B, S, D).astype(x.dtype)


# ---- pure-JAX references -------------------------------------------------------
def ffn_ref(x, w1, b1, w2, b2):
    """Exact f32 reference matching the PyTorch forward."""
    h = jax.nn.gelu(jnp.einsum("bsd,id->bsi", x, w1) + b1, approximate=False)
    return jnp.einsum("bsi,di->bsd", h, w2) + b2


def ffn_ref_bf16(x, w1, b1, w2, b2):
    """Reference with the same bf16 quantization points as the kernel."""
    f32, bf16 = jnp.float32, jnp.bfloat16
    xq = x.astype(bf16).astype(f32)
    w1q = w1.astype(bf16).astype(f32)
    w2q = w2.astype(bf16).astype(f32)
    h = jax.nn.gelu(jnp.einsum("bsd,id->bsi", xq, w1q) + b1, approximate=False)
    h = h.astype(bf16).astype(f32)
    return jnp.einsum("bsi,di->bsd", h, w2q) + b2


if __name__ == "__main__":
    B, S, D_MODEL, D_INNER = 2, 8, 32, 64  # batch, seq, d_model, d_inner
    key = jax.random.PRNGKey(0)
    kx, kw1, kb1, kw2, kb2 = jax.random.split(key, 5)

    x = jax.random.normal(kx, (B, S, D_MODEL), dtype=jnp.float32)
    # PyTorch nn.Linear layout: weight (out, in), bias (out,)
    bound1 = 1.0 / jnp.sqrt(D_MODEL)
    bound2 = 1.0 / jnp.sqrt(D_INNER)
    w1 = jax.random.uniform(kw1, (D_INNER, D_MODEL), jnp.float32, -bound1, bound1)
    b1 = jax.random.uniform(kb1, (D_INNER,), jnp.float32, -bound1, bound1)
    w2 = jax.random.uniform(kw2, (D_MODEL, D_INNER), jnp.float32, -bound2, bound2)
    b2 = jax.random.uniform(kb2, (D_MODEL,), jnp.float32, -bound2, bound2)

    params = prepare_ffn_params(w1, b1, w2, b2)   # done once, outside the hot path
    y = jax.block_until_ready(feed_forward(x, params))

    y_ref = ffn_ref_bf16(x, w1, b1, w2, b2)       # same quantization points as kernel
    assert y.shape == x.shape
    assert jnp.allclose(y, y_ref, atol=2e-2, rtol=2e-2), "mismatch vs reference"

    print("KERNEL_OK")
</pallas_src>

<mosaic_0001>
module attributes {stable_mosaic.version = 11 : i64} {
  func.func @ffn_kernel(%arg0: i32, %arg1: i32, %arg2: memref<16x128xbf16, #tpu.memory_space<vmem>>, %arg3: memref<128x128xbf16, #tpu.memory_space<vmem>>, %arg4: memref<1x128xf32, #tpu.memory_space<vmem>>, %arg5: memref<128x128xbf16, #tpu.memory_space<vmem>>, %arg6: memref<1x128xf32, #tpu.memory_space<vmem>>, %arg7: memref<16x128xf32, #tpu.memory_space<vmem>>) attributes {dimension_semantics = [#tpu.dimension_semantics<parallel>, #tpu.dimension_semantics<arbitrary>], iteration_bounds = array<i64: 1, 1>, scalar_prefetch = 0 : i64, scratch_operands = 0 : i64, tpu.core_type = #tpu.core_type<tc>, window_params = [{transform_indices = @transform_0, window_bounds = array<i64: 16, 128>}, {transform_indices = @transform_1, window_bounds = array<i64: 128, 128>}, {transform_indices = @transform_2, window_bounds = array<i64: 1, 128>}, {transform_indices = @transform_3, window_bounds = array<i64: 128, 128>}, {pipeline_mode = #tpu.pipeline_mode<synchronous>, transform_indices = @transform_4, window_bounds = array<i64: 1, 128>}, {transform_indices = @transform_5, window_bounds = array<i64: 16, 128>}]} {
    %c0_i32 = arith.constant 0 : i32
    %0 = arith.cmpi eq, %arg1, %c0_i32 : i32
    %1 = arith.extui %0 : i1 to i32
    %c0_i32_0 = arith.constant 0 : i32
    %2 = arith.cmpi ne, %1, %c0_i32_0 : i32
    scf.if %2 {
      %cst_29 = arith.constant 0.000000e+00 : f32
      %57 = vector.broadcast %cst_29 : f32 to vector<16x128xf32>
      %c0_30 = arith.constant 0 : index
      %c0_31 = arith.constant 0 : index
      %58 = vector.load %arg7[%c0_30, %c0_31] : memref<16x128xf32, #tpu.memory_space<vmem>>, vector<16x128xf32>
      tpu.vector_store %arg7[%c0_30, %c0_31], %57 {strides = array<i32>} : memref<16x128xf32, #tpu.memory_space<vmem>>, vector<16x128xf32>,
    } else {
    }
    %c0 = arith.constant 0 : index
    %c0_1 = arith.constant 0 : index
    %3 = vector.load %arg2[%c0, %c0_1] : memref<16x128xbf16, #tpu.memory_space<vmem>>, vector<16x128xbf16>
    %c0_2 = arith.constant 0 : index
    %c0_3 = arith.constant 0 : index
    %4 = vector.load %arg3[%c0_2, %c0_3] : memref<128x128xbf16, #tpu.memory_space<vmem>>, vector<128x128xbf16>
    %cst = arith.constant dense<0.000000e+00> : vector<16x128xf32>
    %5 = tpu.matmul %3, %4, %cst {dimension_numbers = #tpu.dot_dimension_numbers<[1], [0], [0], [1], [0, 0, 1, 1], [], []>} : vector<16x128xbf16>, vector<128x128xbf16>, vector<16x128xf32> -> vector<16x128xf32>
    %c0_4 = arith.constant 0 : index
    %c0_5 = arith.constant 0 : index
    %6 = vector.load %arg4[%c0_4, %c0_5] : memref<1x128xf32, #tpu.memory_space<vmem>>, vector<1x128xf32>
    %7 = vector.broadcast %6 : vector<1x128xf32> to vector<16x128xf32>
    %8 = arith.addf %5, %7 : vector<16x128xf32>
    %cst_6 = arith.constant 5.000000e-01 : f32
    %9 = vector.broadcast %cst_6 : f32 to vector<16x128xf32>
    %10 = arith.mulf %9, %8 : vector<16x128xf32>
    %cst_7 = arith.constant 0.707106769 : f32
    %11 = vector.broadcast %cst_7 : f32 to vector<16x128xf32>
    %12 = arith.mulf %8, %11 : vector<16x128xf32>
    %13 = math.absf %12 : vector<16x128xf32>
    %cst_8 = arith.constant 0.327591091 : f32
    %14 = vector.broadcast %cst_8 : f32 to vector<16x128xf32>
    %15 = arith.mulf %14, %13 : vector<16x128xf32>
    %cst_9 = arith.constant 1.000000e+00 : f32
    %16 = vector.broadcast %cst_9 : f32 to vector<16x128xf32>
    %17 = arith.addf %16, %15 : vector<16x128xf32>
    %18 = tpu.reciprocal %17 {approx = true} : vector<16x128xf32> -> vector<16x128xf32>
    %cst_10 = arith.constant 1.06140542 : f32
    %19 = vector.broadcast %cst_10 : f32 to vector<16x128xf32>
    %20 = arith.mulf %18, %19 : vector<16x128xf32>
    %cst_11 = arith.constant -1.45315206 : f32
    %21 = vector.broadcast %cst_11 : f32 to vector<16x128xf32>
    %22 = arith.addf %21, %20 : vector<16x128xf32>
    %23 = arith.mulf %18, %22 : vector<16x128xf32>
    %cst_12 = arith.constant 1.42141378 : f32
    %24 = vector.broadcast %cst_12 : f32 to vector<16x128xf32>
    %25 = arith.addf %24, %23 : vector<16x128xf32>
    %26 = arith.mulf %18, %25 : vector<16x128xf32>
    %cst_13 = arith.constant -0.284496725 : f32
    %27 = vector.broadcast %cst_13 : f32 to vector<16x128xf32>
    %28 = arith.addf %27, %26 : vector<16x128xf32>
    %29 = arith.mulf %18, %28 : vector<16x128xf32>
    %cst_14 = arith.constant 0.254829586 : f32
    %30 = vector.broadcast %cst_14 : f32 to vector<16x128xf32>
    %31 = arith.addf %30, %29 : vector<16x128xf32>
    %32 = arith.mulf %18, %31 : vector<16x128xf32>
    %cst_15 = arith.constant 0.000000e+00 : f32
    %33 = vector.broadcast %cst_15 : f32 to vector<16x128xf32>
    %34 = arith.subf %33, %13 : vector<16x128xf32>
    %35 = arith.mulf %34, %13 : vector<16x128xf32>
    %36 = math.exp %35 : vector<16x128xf32>
    %37 = arith.mulf %32, %36 : vector<16x128xf32>
    %cst_16 = arith.constant 1.000000e+00 : f32
    %38 = vector.broadcast %cst_16 : f32 to vector<16x128xf32>
    %39 = arith.subf %38, %37 : vector<16x128xf32>
    %cst_17 = arith.constant 0.000000e+00 : f32
    %40 = vector.broadcast %cst_17 : f32 to vector<16x128xf32>
    %41 = arith.cmpf olt, %12, %40 : vector<16x128xf32>
    %cst_18 = arith.constant 0.000000e+00 : f32
    %42 = vector.broadcast %cst_18 : f32 to vector<16x128xf32>
    %43 = arith.subf %42, %39 : vector<16x128xf32>
    %44 = arith.select %41, %43, %39 : vector<16x128xi1>, vector<16x128xf32>
    %cst_19 = arith.constant 1.000000e+00 : f32
    %45 = vector.broadcast %cst_19 : f32 to vector<16x128xf32>
    %46 = arith.addf %45, %44 : vector<16x128xf32>
    %47 = arith.mulf %10, %46 : vector<16x128xf32>
    %c0_20 = arith.constant 0 : index
    %c0_21 = arith.constant 0 : index
    %48 = vector.load %arg7[%c0_20, %c0_21] : memref<16x128xf32, #tpu.memory_space<vmem>>, vector<16x128xf32>
    %49 = arith.truncf %47 : vector<16x128xf32> to vector<16x128xbf16>
    %c0_22 = arith.constant 0 : index
    %c0_23 = arith.constant 0 : index
    %50 = vector.load %arg5[%c0_22, %c0_23] : memref<128x128xbf16, #tpu.memory_space<vmem>>, vector<128x128xbf16>
    %cst_24 = arith.constant dense<0.000000e+00> : vector<16x128xf32>
    %51 = tpu.matmul %49, %50, %cst_24 {dimension_numbers = #tpu.dot_dimension_numbers<[1], [0], [0], [1], [0, 0, 1, 1], [], []>} : vector<16x128xbf16>, vector<128x128xbf16>, vector<16x128xf32> -> vector<16x128xf32>
    %52 = arith.addf %48, %51 : vector<16x128xf32>
    %c0_25 = arith.constant 0 : index
    %c0_26 = arith.constant 0 : index
    %53 = vector.load %arg7[%c0_25, %c0_26] : memref<16x128xf32, #tpu.memory_space<vmem>>, vector<16x128xf32>
    tpu.vector_store %arg7[%c0_25, %c0_26], %52 {strides = array<i32>} : memref<16x128xf32, #tpu.memory_space<vmem>>, vector<16x128xf32>,
    %c0_i32_27 = arith.constant 0 : i32
    %54 = arith.cmpi eq, %arg1, %c0_i32_27 : i32
    %55 = arith.extui %54 : i1 to i32
    %c0_i32_28 = arith.constant 0 : i32
    %56 = arith.cmpi ne, %55, %c0_i32_28 : i32
    scf.if %56 {
      %c0_29 = arith.constant 0 : index
      %c0_30 = arith.constant 0 : index
      %57 = vector.load %arg7[%c0_29, %c0_30] : memref<16x128xf32, #tpu.memory_space<vmem>>, vector<16x128xf32>
      %c0_31 = arith.constant 0 : index
      %c0_32 = arith.constant 0 : index
      %58 = vector.load %arg6[%c0_31, %c0_32] : memref<1x128xf32, #tpu.memory_space<vmem>>, vector<1x128xf32>
      %59 = vector.broadcast %58 : vector<1x128xf32> to vector<16x128xf32>
      %60 = arith.addf %57, %59 : vector<16x128xf32>
      %c0_33 = arith.constant 0 : index
      %c0_34 = arith.constant 0 : index
      %61 = vector.load %arg7[%c0_33, %c0_34] : memref<16x128xf32, #tpu.memory_space<vmem>>, vector<16x128xf32>
      tpu.vector_store %arg7[%c0_33, %c0_34], %60 {strides = array<i32>} : memref<16x128xf32, #tpu.memory_space<vmem>>, vector<16x128xf32>,
    } else {
    }
    return
  }
  func.func @transform_0(%arg0: i32, %arg1: i32) -> (i32, i32) {
    %c0_i32 = arith.constant 0 : i32
    %c0_i32_0 = arith.constant 0 : i32
    return %arg0, %c0_i32 : i32, i32
  }
  func.func @transform_1(%arg0: i32, %arg1: i32) -> (i32, i32) {
    %c0_i32 = arith.constant 0 : i32
    %c0_i32_0 = arith.constant 0 : i32
    return %c0_i32, %arg1 : i32, i32
  }
  func.func @transform_2(%arg0: i32, %arg1: i32) -> (i32, i32) {
    %c0_i32 = arith.constant 0 : i32
    %c0_i32_0 = arith.constant 0 : i32
    return %c0_i32, %arg1 : i32, i32
  }
  func.func @transform_3(%arg0: i32, %arg1: i32) -> (i32, i32) {
    %c0_i32 = arith.constant 0 : i32
    %c0_i32_0 = arith.constant 0 : i32
    return %arg1, %c0_i32 : i32, i32
  }
  func.func @transform_4(%arg0: i32, %arg1: i32) -> (i32, i32) {
    %c0_i32 = arith.constant 0 : i32
    %c0_i32_0 = arith.constant 0 : i32
    %c0_i32_1 = arith.constant 0 : i32
    return %c0_i32, %c0_i32_0 : i32, i32
  }
  func.func @transform_5(%arg0: i32, %arg1: i32) -> (i32, i32) {
    %c0_i32 = arith.constant 0 : i32
    %c0_i32_0 = arith.constant 0 : i32
    return %arg0, %c0_i32 : i32, i32
  }
}

</mosaic_0001>

<bundles_post_ra>
// kernel: tpu_custom_call.1
= control target key start
LH: loop header
LB: loop body
LE: loop exit
PB: predicated region body
PF: predicated region fallthrough
CT: control target
= control target key end

     0   :  { %10 = vsyncpa [#allocation3], 0  ;;  %s600_s0 = inlined_call_operand.hbm [shape: bf16[16,128], index: 0, kind: input, shape index: {}]   ;;  %s601_s1 = inlined_call_operand.hbm [shape: bf16[128,128], index: 1, kind: input, shape index: {}]   ;;  %s602_s2 = inlined_call_operand.vmem [shape: f32[1,128], index: 2, kind: input, shape index: {}]   ;;  %s603_s3 = inlined_call_operand.hbm [shape: bf16[128,128], index: 3, kind: input, shape index: {}]   ;;  %s604_s4 = inlined_call_operand.vmem [shape: f32[1,128], index: 4, kind: input, shape index: {}]   ;;  %s605_s5 = inlined_call_operand.hbm [shape: f32[16,128], index: 5, kind: output, shape index: {}]  }
   0x1   :  { %11 = vsyncpa [#allocation6], 0 }
   0x2   :  { %12 = vsyncpa [#allocation4], 0  ;;  %s30_s20 = sshll.u32 %s601_s1, 4  ;;  %s540_s21 = smov [#allocation5]   ;;  %s31_s20 = int_to_ptr.hbm [resolvable:$true] %s30_s20 }
   0x3   :  { %s32_s22 = sshll.u32 %s540_s21, 4  ;;  %s17_s25 = sshll.u32 %s600_s0, 4  ;;  %s33_s22 = int_to_ptr.vmem [resolvable:$true] %s32_s22  ;;  %s18_s25 = int_to_ptr.hbm [resolvable:$true] %s17_s25 }
   0x4   :  { %s541_s26 = smov 64   ;;  %s542_s27 = smov 4  }
   0x5   :  { %38 = dma.hbm_to_vmem [thread:$0]  %s31_s20, 1024, %s33_s22, [#allocation6], %s541_s26, %s541_s26, %s542_s27  }
   0x6   :  { %s543_s28 = smov [#allocation2]   ;;  %s45_s7 = sshll.u32 %s603_s3, 4  ;;  %s46_s7 = int_to_ptr.hbm [resolvable:$true] %s45_s7 }
   0x7   :  { %s19_s29 = sshll.u32 %s543_s28, 4  ;;  %s544_s1 = smov [#allocation7]   ;;  %s20_s29 = int_to_ptr.vmem [resolvable:$true] %s19_s29 }
   0x8   :  { %25 = dma.hbm_to_vmem [thread:$0]  %s18_s25, 128, %s20_s29, [#allocation3], %s541_s26, %s541_s26, %s542_s27  }
   0x9   :  { %s47_s8 = sshll.u32 %s544_s1, 4  ;;  %s48_s8 = int_to_ptr.vmem [resolvable:$true] %s47_s8 }
   0xa   :  { %53 = dma.hbm_to_vmem [thread:$0]  %s46_s7, 1024, %s48_s8, [#allocation6], %s541_s26, %s541_s26, %s542_s27  }
   0xb   :  { %534 = dma.done.wait [#allocation3], 128  }
   0xc   :  { %535 = vsyncadd [#allocation3], 4294967168 }
   0xd   :  { %536 = dma.done.wait [#allocation6], 2048  }
   0xe   :  { %537 = vsyncadd [#allocation6], 4294965248  ;;  %v410_v0 = vld [vmem:[#allocation5 + $0x38] sm:$0xff]  ;;  %v409_v1 = vld [vmem:[#allocation5 + $0x30] sm:$0xff]  ;;  %s545_s10 = smov [#allocation8]   ;;  %s320_s14 = sshll.u32 %s605_s5, 4  ;;  %s321_s14 = int_to_ptr.hbm [resolvable:$true] %s320_s14 }
   0xf   :  { %150 = vmatpush.bf16.msra.mxu0 %v410_v0  ;;  %v408_v2 = vld [vmem:[#allocation5 + $0x28] sm:$0xff]  ;;  %v407_v3 = vld [vmem:[#allocation5 + $0x20] sm:$0xff]  ;;  %v406_v4 = vld [vmem:[#allocation5 + $0x18] sm:$0xff]  ;;  %s318_s11 = sshll.u32 %s545_s10, 4  ;;  %s546_s15 = smov 128   ;;  %s319_s11 = int_to_ptr.vmem [resolvable:$true] %s318_s11 }
  0x10   :  { %v405_v5 = vld [vmem:[#allocation5 + $0x10] sm:$0xff]  ;;  %v404_v6 = vld [vmem:[#allocation5 + $0x8] sm:$0xff]  ;;  %v403_v7 = vld [vmem:[#allocation5] sm:$0xff]  ;;  %s547_s16 = smov 8  }
  0x11   :  { %v402_v8 = vld [vmem:[#allocation2] sm:$0xff]  ;;  %v417_v10 = vld [vmem:[#allocation7 + $0x30] sm:$0xff]  ;;  %v416_v11 = vld [vmem:[#allocation7 + $0x28] sm:$0xff] }
  0x12   :  { %v418_v9 = vld [vmem:[#allocation7 + $0x38] sm:$0xff]  ;;  %v415_v13 = vld [vmem:[#allocation7 + $0x20] sm:$0xff]  ;;  %v413_v20 = vld [vmem:[#allocation7 + $0x10] sm:$0xff] }
  0x13   :  { %151 = vmatpush.bf16.msra.mxu0 %v409_v1  ;;  %283 = vmatpush.bf16.msra.mxu1 %v418_v9  ;;  %v428_v12 = vld [vmem:[%s602_s2] ss:$0 sm:$0xff]  ;;  %v412_v25 = vld [vmem:[#allocation7 + $0x8] sm:$0xff]  ;;  %v411_v28 = vld [vmem:[#allocation7] sm:$0xff] }
  0x14   :  { %v414_v17 = vld [vmem:[#allocation7 + $0x18] sm:$0xff] }
  0x15   :  { %v429_v9 = vld [vmem:[%s604_s4] ss:$0 sm:$0xff] }
  0x17   :  { %152 = vmatpush.bf16.msra.mxu0 %v408_v2  ;;  %284 = vmatpush.bf16.msra.mxu1 %v417_v10 }
  0x1b   :  { %153 = vmatpush.bf16.msra.mxu0 %v407_v3  ;;  %285 = vmatpush.bf16.msra.mxu1 %v416_v11 }
  0x1f   :  { %154 = vmatpush.bf16.msra.mxu0 %v406_v4  ;;  %286 = vmatpush.bf16.msra.mxu1 %v415_v13 }
  0x23   :  { %155 = vmatpush.bf16.msra.mxu0 %v405_v5  ;;  %287 = vmatpush.bf16.msra.mxu1 %v414_v17 }
  0x27   :  { %156 = vmatpush.bf16.msra.mxu0 %v404_v6  ;;  %288 = vmatpush.bf16.msra.mxu1 %v413_v20 }
  0x2b   :  { %157 = vmatpush.bf16.msra.mxu0 %v403_v7  ;;  %289 = vmatpush.bf16.msra.mxu1 %v412_v25 }
  0x2e   :  { %158 = vmatmul.bf16.vlgmr.msra.gmra.mxu0 %v402_v8 }
  0x2f   :  { %290 = vmatpush.bf16.msra.mxu1 %v411_v28 }
  0xab   :  { %v159_v14 = vpop.f32.mrf.mxu0 }
  0xac   :  { %v590_v15 = vadd.f32 %v428_v12, %v159_v14 }
  0xae   :  { %v166_v16 = vmul.f32 0.70710677, %v590_v15  ;;  %v164_v3 = vmul.f32 0.5, %v590_v15 }
  0xb0   :  { %v168_v18 = vand.u32 2147483647, %v166_v16  ;;  %vm206_vm0 = vcmp.lt.f32.partialorder %v166_v16, 0.0 }
  0xb2   :  { %v170_v19 = vmul.f32 0.3275911, %v168_v18  ;;  %v194_v30 = vsub.f32 0.0, %v168_v18 }
  0xb3   :  { %v161_v21 = vpop.f32.mrf.mxu0 }
  0xb4   :  { %v172_v22 = vadd.f32 1.0, %v170_v19  ;;  %v162_v23 = vadd.f32 %v428_v12, %v161_v21  ;;  %v196_v34 = vmul.f32 %v194_v30, %v168_v18 }
  0xb6   :  { %430 = vrcp.f32 %v172_v22  ;;  %v167_v24 = vmul.f32 0.70710677, %v162_v23  ;;  %v198_v38 = vmul.f32 1.442695, %v196_v34  ;;  %v165_v4 = vmul.f32 0.5, %v162_v23 }
  0xb8   :  { %v169_v26 = vand.u32 2147483647, %v167_v24  ;;  %vm207_vm1 = vcmp.lt.f32.partialorder %v167_v24, 0.0 }
  0xba   :  { %v171_v27 = vmul.f32 0.3275911, %v169_v26  ;;  %v195_v39 = vsub.f32 0.0, %v169_v26 }
  0xbc   :  { %v431_v29 = vpop.eup %430  ;;  %v173_v31 = vadd.f32 1.0, %v171_v27  ;;  %v197_v44 = vmul.f32 %v195_v39, %v169_v26 }
  0xbd   :  { %v176_v32 = vmul.f32 1.0614054, %v431_v29 }
  0xbe   :  { %432 = vrcp.f32 %v173_v31  ;;  %v200_v49 = vmul.f32 1.442695, %v197_v44 }
  0xbf   :  { %v178_v33 = vadd.f32 -1.4531521, %v176_v32  ;;  %434 = vpow2.f32 %v198_v38 }
  0xc0   :  { %436 = vpow2.f32 %v200_v49 }
  0xc1   :  { %v180_v35 = vmul.f32 %v431_v29, %v178_v33 }
  0xc3   :  { %v182_v36 = vadd.f32 1.4214138, %v180_v35 }
  0xc4   :  { %v433_v37 = vpop.eup %432 }
  0xc5   :  { %v177_v40 = vmul.f32 1.0614054, %v433_v37  ;;  %v184_v41 = vmul.f32 %v431_v29, %v182_v36  ;;  %v435_v52 = vpop.eup %434 }
  0xc6   :  { %v437_v60 = vpop.eup %436 }
  0xc7   :  { %v179_v42 = vadd.f32 -1.4531521, %v177_v40  ;;  %v186_v43 = vadd.f32 -0.28449672, %v184_v41 }
  0xc9   :  { %v181_v45 = vmul.f32 %v433_v37, %v179_v42  ;;  %v188_v46 = vmul.f32 %v431_v29, %v186_v43 }
  0xcb   :  { %v183_v47 = vadd.f32 1.4214138, %v181_v45  ;;  %v190_v48 = vadd.f32 0.2548296, %v188_v46 }
  0xcd   :  { %v185_v50 = vmul.f32 %v433_v37, %v183_v47  ;;  %v192_v51 = vmul.f32 %v431_v29, %v190_v48 }
  0xcf   :  { %v187_v53 = vadd.f32 -0.28449672, %v185_v50  ;;  %v202_v54 = vmul.f32 %v435_v52, %v192_v51 }
  0xd1   :  { %v189_v55 = vmul.f32 %v433_v37, %v187_v53  ;;  %v204_v56 = vsub.f32 1.0, %v202_v54 }
  0xd3   :  { %v191_v57 = vadd.f32 0.2548296, %v189_v55  ;;  %v208_v59 = vsub.f32 0.0, %v204_v56 }
  0xd5   :  { %v193_v58 = vmul.f32 %v433_v37, %v191_v57  ;;  %v210_v63 = vsel %vm206_vm0, %v208_v59, %v204_v56 }
  0xd6   :  { %v212_v1 = vadd.f32 1.0, %v210_v63 }
  0xd7   :  { %v203_v61 = vmul.f32 %v437_v60, %v193_v58 }
  0xd8   :  { %v214_v6 = vmul.f32 %v212_v1, %v164_v3 }
  0xd9   :  { %v205_v62 = vsub.f32 1.0, %v203_v61 }
  0xdb   :  { %v209_v0 = vsub.f32 0.0, %v205_v62 }
  0xdd   :  { %v211_v2 = vsel %vm207_vm1, %v209_v0, %v205_v62 }
  0xde   :  { %v213_v5 = vadd.f32 1.0, %v211_v2 }
  0xe0   :  { %v215_v7 = vmul.f32 %v213_v5, %v165_v4 }
  0xe2   :  { %v218_v8 = vpack.c.bf16 %v215_v7, %v214_v6 }
  0xe4   :  { %291 = vmatmul.bf16.vlgmr.msra.gmra.mxu1 %v218_v8 }
 0x161   :  { %v292_v10 = vpop.f32.mrf.mxu1 }
 0x162   :  { %v310_v11 = vadd.f32 %v429_v9, %v292_v10 }
 0x164   :  { %312 = vst [vmem:[#allocation8] sm:$0xff] %v310_v11 }
 0x169   :  { %v294_v12 = vpop.f32.mrf.mxu1 }
 0x16a   :  { %v311_v13 = vadd.f32 %v429_v9, %v294_v12 }
 0x16c   :  { %313 = vst [vmem:[#allocation8 + $0x8] sm:$0xff] %v311_v13 }
 0x16d   :  { %326 = dma.vmem_to_hbm [thread:$0]  %s319_s11, 256, %s321_s14, [#allocation4], %s546_s15, %s546_s15, %s547_s16  }
 0x16e   :  { %538 = dma.done.wait [#allocation4], 256  }
 0x16f   :  { %539 = vsyncadd [#allocation4], 4294967040 }
 0x170   :  { %331 = vsyncpa [#allocation3], 1 }
 0x171   :  { %332 = vsyncpa [#allocation6], 1 }
 0x172   :  { %333 = vsyncpa [#allocation4], 1 }

</bundles_post_ra>
